<compile_context>
chip_gen: v5e
topology: v5e:2x2
jax: 0.10.0
libtpu: 0.0.40
codegen_flags: <defaults>
</compile_context>

<pallas_src>
import jax
import jax.numpy as jnp
import numpy as np
from jax.experimental import pallas as pl
from jax.experimental.pallas import tpu as pltpu


# ------------------------------ kernels --------------------------------------

def _encoder_kernel_out_acc(x_ref, w_ref, b_ref, o_ref):
    """f32 output: accumulate directly into o_ref (resident across K axis)."""
    k = pl.program_id(2)

    @pl.when(k == 0)
    def _init():
        # Fold the bias into the accumulator once.
        o_ref[...] = jnp.broadcast_to(b_ref[...], o_ref.shape)

    o_ref[...] += jnp.dot(x_ref[...], w_ref[...],
                          preferred_element_type=jnp.float32)

    @pl.when(k == pl.num_programs(2) - 1)
    def _finalize():
        # tanh in f32 on the EUP (free slot relative to the MXU).
        o_ref[...] = jnp.tanh(o_ref[...])


def _encoder_kernel_scratch(x_ref, w_ref, b_ref, o_ref, acc_ref):
    """Non-f32 output: f32 VMEM scratch accumulator, cast on finalize."""
    k = pl.program_id(2)

    @pl.when(k == 0)
    def _init():
        acc_ref[...] = jnp.broadcast_to(b_ref[...], acc_ref.shape)

    acc_ref[...] += jnp.dot(x_ref[...], w_ref[...],
                            preferred_element_type=jnp.float32)

    @pl.when(k == pl.num_programs(2) - 1)
    def _finalize():
        o_ref[...] = jnp.tanh(acc_ref[...]).astype(o_ref.dtype)


# ------------------------------ wrapper ---------------------------------------

def _pick_tk(D):
    # K tile MUST exactly cover D (garbage in the reduction axis corrupts the
    # accumulation), so pick a 128-multiple that divides D, else take the
    # whole reduction axis as one block (block dim == array dim is legal for
    # any size; PINN encoders have tiny input_dim so this is the common case).
    for cand in (512, 256, 128):
        if D % cand == 0:
            return cand
    return D


def _pick_tn(H):
    if H <= 128:
        return H            # full dim: legal even if not 128-aligned
    for cand in (512, 256, 128):
        if cand <= H:
            return cand     # 128-multiple; N tail is masked on store
    return H


def _pick_tm(B):
    # Full batch as one block when small (legal: block == array dim),
    # else 512-row tiles (divisible by 8); M tail is masked on store.
    return B if B <= 512 else 512


def encoder_forward(x, w, b, *, mxu_dtype=jnp.bfloat16, tm=None, tn=None, tk=None):
    B, D = x.shape
    Din, H = w.shape
    assert Din == D, "weight must be laid out as [input_dim, hidden_dim]"
    assert b.shape == (H,)

    out_dtype = x.dtype

    tk = _pick_tk(D) if tk is None else tk
    tn = _pick_tn(H) if tn is None else tn
    tm = _pick_tm(B) if tm is None else tm
    assert D % tk == 0, "K tiles must exactly cover D (no garbage in reduction)"

    # MXU-friendly operand dtype. In a real model, cast W once at init and
    # pass it pre-cast -- the casts below are skipped if dtypes already match.
    if mxu_dtype is not None:
        if x.dtype != mxu_dtype:
            x = x.astype(mxu_dtype)
        if w.dtype != mxu_dtype:
            w = w.astype(mxu_dtype)
    b2 = b.reshape(1, H).astype(jnp.float32)

    grid = (pl.cdiv(B, tm), pl.cdiv(H, tn), D // tk)

    use_out_acc = out_dtype == jnp.float32
    kernel = _encoder_kernel_out_acc if use_out_acc else _encoder_kernel_scratch
    scratch_shapes = [] if use_out_acc else [pltpu.VMEM((tm, tn), jnp.float32)]

    return pl.pallas_call(
        kernel,
        out_shape=jax.ShapeDtypeStruct((B, H), out_dtype),
        grid=grid,
        in_specs=[
            pl.BlockSpec((tm, tk), lambda i, j, k: (i, k)),   # x tile  (M, K)
            pl.BlockSpec((tk, tn), lambda i, j, k: (k, j)),   # W tile  (K, N)
            pl.BlockSpec((1, tn), lambda i, j, k: (0, j)),    # bias row (N)
        ],
        out_specs=pl.BlockSpec((tm, tn), lambda i, j, k: (i, j)),
        scratch_shapes=scratch_shapes,
        compiler_params=pltpu.CompilerParams(
            dimension_semantics=("parallel", "parallel", "arbitrary"),
            # ~6 MiB double-buffered footprint at the largest default tiles;
            # 32 MiB is safely under v7x's 64 MiB physical VMEM.
            vmem_limit_bytes=32 * 1024 * 1024,
        ),
    )(x, w, b2)


def xavier_uniform(key, fan_in, fan_out, dtype=jnp.float32):
    # Matches torch.nn.init.xavier_uniform_ (gain=1) for a Linear weight.
    limit = float(np.sqrt(6.0 / (fan_in + fan_out)))
    return jax.random.uniform(key, (fan_in, fan_out), dtype=dtype,
                              minval=-limit, maxval=limit)


if __name__ == "__main__":
    input_dim = 4
    hidden_dim = 32
    batch = 8

    key = jax.random.PRNGKey(0)
    kx, kw = jax.random.split(key)

    x = jax.random.normal(kx, (batch, input_dim), dtype=jnp.float32)
    # Deterministic parameter init (xavier-uniform weight, zero bias).
    w = xavier_uniform(kw, input_dim, hidden_dim)       # [input_dim, hidden_dim]
    b = jnp.zeros((hidden_dim,), dtype=jnp.float32)

    fwd = jax.jit(encoder_forward)
    out = jax.block_until_ready(fwd(x, w, b))

    # Pure-JAX reference (f32); loose tolerance accounts for bf16 MXU operands.
    ref = jnp.tanh(x @ w + b)
    np.testing.assert_allclose(np.asarray(out), np.asarray(ref),
                               rtol=2e-2, atol=2e-2)

    # Exercise the tiled / boundary-masked (cdiv) path at a small non-128-
    # aligned hidden size: grid = (1, 2, 1), N tail masked on store.
    kx2, kw2 = jax.random.split(jax.random.PRNGKey(1))
    x2 = jax.random.normal(kx2, (100, input_dim), dtype=jnp.float32)
    w2 = xavier_uniform(kw2, input_dim, 200)
    b2 = jnp.zeros((200,), dtype=jnp.float32)
    out2 = jax.block_until_ready(jax.jit(encoder_forward)(x2, w2, b2))
    ref2 = jnp.tanh(x2 @ w2 + b2)
    np.testing.assert_allclose(np.asarray(out2), np.asarray(ref2),
                               rtol=2e-2, atol=2e-2)

    print("KERNEL_OK")
</pallas_src>

<mosaic_0001>
module attributes {stable_mosaic.version = 11 : i64} {
  func.func @_encoder_kernel_out_acc(%arg0: i32, %arg1: i32, %arg2: i32, %arg3: memref<8x4xbf16, #tpu.memory_space<vmem>>, %arg4: memref<4x32xbf16, #tpu.memory_space<vmem>>, %arg5: memref<1x32xf32, #tpu.memory_space<vmem>>, %arg6: memref<8x32xf32, #tpu.memory_space<vmem>>) attributes {dimension_semantics = [#tpu.dimension_semantics<parallel>, #tpu.dimension_semantics<parallel>, #tpu.dimension_semantics<arbitrary>], iteration_bounds = array<i64: 1, 1, 1>, scalar_prefetch = 0 : i64, scratch_operands = 0 : i64, tpu.core_type = #tpu.core_type<tc>, window_params = [{transform_indices = @transform_0, window_bounds = array<i64: 8, 4>}, {transform_indices = @transform_1, window_bounds = array<i64: 4, 32>}, {transform_indices = @transform_2, window_bounds = array<i64: 1, 32>}, {transform_indices = @transform_3, window_bounds = array<i64: 8, 32>}]} {
    %c0_i32 = arith.constant 0 : i32
    %0 = arith.cmpi eq, %arg2, %c0_i32 : i32
    %1 = arith.extui %0 : i1 to i32
    %c0_i32_0 = arith.constant 0 : i32
    %2 = arith.cmpi ne, %1, %c0_i32_0 : i32
    scf.if %2 {
      %c0_10 = arith.constant 0 : index
      %c0_11 = arith.constant 0 : index
      %12 = vector.load %arg5[%c0_10, %c0_11] : memref<1x32xf32, #tpu.memory_space<vmem>>, vector<1x32xf32>
      %13 = vector.shape_cast %12 : vector<1x32xf32> to vector<1x32xf32>
      %14 = vector.broadcast %13 : vector<1x32xf32> to vector<8x32xf32>
      %c0_12 = arith.constant 0 : index
      %c0_13 = arith.constant 0 : index
      %15 = vector.load %arg6[%c0_12, %c0_13] : memref<8x32xf32, #tpu.memory_space<vmem>>, vector<8x32xf32>
      tpu.vector_store %arg6[%c0_12, %c0_13], %14 {strides = array<i32>} : memref<8x32xf32, #tpu.memory_space<vmem>>, vector<8x32xf32>,
    } else {
    }
    %c0 = arith.constant 0 : index
    %c0_1 = arith.constant 0 : index
    %3 = vector.load %arg6[%c0, %c0_1] : memref<8x32xf32, #tpu.memory_space<vmem>>, vector<8x32xf32>
    %c0_2 = arith.constant 0 : index
    %c0_3 = arith.constant 0 : index
    %4 = vector.load %arg3[%c0_2, %c0_3] : memref<8x4xbf16, #tpu.memory_space<vmem>>, vector<8x4xbf16>
    %c0_4 = arith.constant 0 : index
    %c0_5 = arith.constant 0 : index
    %5 = vector.load %arg4[%c0_4, %c0_5] : memref<4x32xbf16, #tpu.memory_space<vmem>>, vector<4x32xbf16>
    %cst = arith.constant dense<0.000000e+00> : vector<8x32xf32>
    %6 = tpu.matmul %4, %5, %cst {dimension_numbers = #tpu.dot_dimension_numbers<[1], [0], [0], [1], [0, 0, 1, 1], [], []>} : vector<8x4xbf16>, vector<4x32xbf16>, vector<8x32xf32> -> vector<8x32xf32>
    %7 = arith.addf %3, %6 : vector<8x32xf32>
    %c0_6 = arith.constant 0 : index
    %c0_7 = arith.constant 0 : index
    %8 = vector.load %arg6[%c0_6, %c0_7] : memref<8x32xf32, #tpu.memory_space<vmem>>, vector<8x32xf32>
    tpu.vector_store %arg6[%c0_6, %c0_7], %7 {strides = array<i32>} : memref<8x32xf32, #tpu.memory_space<vmem>>, vector<8x32xf32>,
    %c0_i32_8 = arith.constant 0 : i32
    %9 = arith.cmpi eq, %arg2, %c0_i32_8 : i32
    %10 = arith.extui %9 : i1 to i32
    %c0_i32_9 = arith.constant 0 : i32
    %11 = arith.cmpi ne, %10, %c0_i32_9 : i32
    scf.if %11 {
      %c0_10 = arith.constant 0 : index
      %c0_11 = arith.constant 0 : index
      %12 = vector.load %arg6[%c0_10, %c0_11] : memref<8x32xf32, #tpu.memory_space<vmem>>, vector<8x32xf32>
      %13 = math.tanh %12 : vector<8x32xf32>
      %c0_12 = arith.constant 0 : index
      %c0_13 = arith.constant 0 : index
      %14 = vector.load %arg6[%c0_12, %c0_13] : memref<8x32xf32, #tpu.memory_space<vmem>>, vector<8x32xf32>
      tpu.vector_store %arg6[%c0_12, %c0_13], %13 {strides = array<i32>} : memref<8x32xf32, #tpu.memory_space<vmem>>, vector<8x32xf32>,
    } else {
    }
    return
  }
  func.func @transform_0(%arg0: i32, %arg1: i32, %arg2: i32) -> (i32, i32) {
    %c0_i32 = arith.constant 0 : i32
    return %arg0, %arg2 : i32, i32
  }
  func.func @transform_1(%arg0: i32, %arg1: i32, %arg2: i32) -> (i32, i32) {
    %c0_i32 = arith.constant 0 : i32
    return %arg2, %arg1 : i32, i32
  }
  func.func @transform_2(%arg0: i32, %arg1: i32, %arg2: i32) -> (i32, i32) {
    %c0_i32 = arith.constant 0 : i32
    %c0_i32_0 = arith.constant 0 : i32
    return %c0_i32, %arg1 : i32, i32
  }
  func.func @transform_3(%arg0: i32, %arg1: i32, %arg2: i32) -> (i32, i32) {
    %c0_i32 = arith.constant 0 : i32
    return %arg0, %arg1 : i32, i32
  }
}

</mosaic_0001>

<bundles_post_ra>
// kernel: encoder_forward.1
= control target key start
LH: loop header
LB: loop body
LE: loop exit
PB: predicated region body
PF: predicated region fallthrough
CT: control target
= control target key end

     0   :  { %vm33_vm0 = vcmask 1041408   ;;  %vm24_vm1 = vcmask 261120   ;;  %vm29_vm2 = vcmask 31744   ;;  %s142_s0 = inlined_call_operand.vmem [shape: bf16[8,4], index: 0, kind: input, shape index: {}]   ;;  %s143_s1 = inlined_call_operand.vmem [shape: bf16[4,32], index: 1, kind: input, shape index: {}]   ;;  %s144_s2 = inlined_call_operand.vmem [shape: f32[1,32], index: 2, kind: input, shape index: {}]   ;;  %s145_s3 = inlined_call_operand.hbm [shape: f32[8,32], index: 3, kind: output, shape index: {}]  }
   0x1   :  { %v28_v0 = vld [vmem:[%s143_s1] sm:$0x3] }
   0x2   :  { %v35_v1 = vsel %vm33_vm0, %v28_v0, 0  ;;  %v77_v2 = vld [vmem:[%s144_s2] ss:$0 sm:$0xff] }
   0x3   :  { %44 = vmatpush.bf16.msra.mxu0 %v35_v1  ;;  %v27_v3 = vld [vmem:[%s142_s0] sm:$0xf] }
   0x4   :  { %8 = vsyncpa [#allocation3], 0  ;;  %25 = vst.msk [vmem:[#allocation2] sm:$0xff] %vm24_vm1, %v77_v2  ;;  %s106_s1 = smov [#allocation2]   ;;  %s66_s20 = sshll.u32 %s145_s3, 4  ;;  %s67_s20 = int_to_ptr.hbm [resolvable:$true] %s66_s20 }
   0x5   :  { %s64_s2 = sshll.u32 %s106_s1, 4  ;;  %s65_s2 = int_to_ptr.vmem [resolvable:$true] %s64_s2 }
   0x6   :  { %75 = vmatmul.msk.bf16.vlgmr.msra.gmra.mxu0 %vm29_vm2, %v27_v3 }
   0xb   :  { %v26_v4 = vld [vmem:[#allocation2] sm:$0xff] }
  0x83   :  { %v46_v5 = vpop.f32.mrf.mxu0 }
  0x84   :  { %v50_v6 = vadd.f32 %v46_v5, %v26_v4 }
  0x86   :  { %52 = vst.msk [vmem:[#allocation2] sm:$0xff] %vm24_vm1, %v50_v6 }
  0x8b   :  { %v48_v7 = vpop.f32.mrf.mxu0 }
  0x8d   :  { %v56_v8 = vld [vmem:[#allocation2] sm:$0xff] }
  0x8e   :  { %78 = vtanh.f32 %v56_v8 }
  0x94   :  { %v79_v9 = vpop.eup %78 }
  0x95   :  { %58 = vst.msk [vmem:[#allocation2] sm:$0xff] %vm24_vm1, %v79_v9 }
  0x96   :  { %69 = dma.vmem_to_hbm [thread:$0]  %s65_s2, 128, %s67_s20, [#allocation3]  }
  0x97   :  { %104 = dma.done.wait [#allocation3], 128  }
  0x98   :  { %105 = vsyncadd [#allocation3], 4294967168 }
  0x99   :  { %74 = vsyncpa [#allocation3], 1 }

</bundles_post_ra>
